<compile_context>
chip_gen: v7x
topology: tpu7x:2x2x1
jax: 0.10.0
libtpu: 0.0.40
codegen_flags: <defaults>
</compile_context>

<pallas_src>
import jax
import jax.numpy as jnp
from jax.experimental import pallas as pl
from jax.experimental.pallas import tpu as pltpu

LANES = 128
SUBLANES_BF16 = 16


def _round_up(x, m):
    return (x + m - 1) // m * m


# ----------------------------------------------------------------------------
# Fused MLP-head kernels (one batch tile per grid step)
# ----------------------------------------------------------------------------
def _head_tail(h1_f32, b1_ref, w2_ref, b2_ref, w3_ref, b3_ref, out_ref):
    h = jnp.maximum(h1_f32 + b1_ref[...], 0.0).astype(jnp.bfloat16)        # (TB, 512)
    h = jnp.dot(h, w2_ref[...], preferred_element_type=jnp.float32)
    h = jnp.maximum(h + b2_ref[...], 0.0).astype(jnp.bfloat16)             # (TB, 128)
    o = jnp.dot(h, w3_ref[...], preferred_element_type=jnp.float32)
    out_ref[...] = (o + b3_ref[...]).astype(out_ref.dtype)                 # (TB, 128) bf16


def _mlp_head_kernel_fused(feat_ref, w1_ref, b1_ref, w2_ref, b2_ref,
                           w3_ref, b3_ref, out_ref):
    # Small-E path: single K=2E contraction (one MXU fill instead of two).
    h = jnp.dot(feat_ref[...], w1_ref[...], preferred_element_type=jnp.float32)
    _head_tail(h, b1_ref, w2_ref, b2_ref, w3_ref, b3_ref, out_ref)


def _mlp_head_kernel_split(img_ref, txt_ref, w1i_ref, w1t_ref, b1_ref,
                           w2_ref, b2_ref, w3_ref, b3_ref, out_ref):
    # Real-CLIP-E path: split W1 -> no concat anywhere (feat@W1 == img@W1[:E]+txt@W1[E:]).
    h = jnp.dot(img_ref[...], w1i_ref[...], preferred_element_type=jnp.float32)
    h = h + jnp.dot(txt_ref[...], w1t_ref[...], preferred_element_type=jnp.float32)
    _head_tail(h, b1_ref, w2_ref, b2_ref, w3_ref, b3_ref, out_ref)


# ----------------------------------------------------------------------------
# One-time weight preprocessing (hoisted out of the forward path)
# ----------------------------------------------------------------------------
def prepare_head_params(params):
    w1, b1 = params["w1"], params["b1"]
    w2, b2 = params["w2"], params["b2"]
    w3, b3 = params["w3"], params["b3"]
    two_e = w1.shape[0]
    E = two_e // 2
    n_out = w3.shape[1]
    n_pad = _round_up(n_out, LANES)

    w3p = jnp.zeros((w3.shape[0], n_pad), jnp.bfloat16).at[:, :n_out].set(
        w3.astype(jnp.bfloat16))
    b3p = jnp.zeros((1, n_pad), jnp.float32).at[:, :n_out].set(
        b3.astype(jnp.float32).reshape(1, -1))

    head = {
        "E": E, "n_out": n_out, "n_pad": n_pad,
        "fuse_fc1": E < LANES,
        "b1": b1.astype(jnp.float32).reshape(1, -1),
        "w2": w2.astype(jnp.bfloat16),
        "b2": b2.astype(jnp.float32).reshape(1, -1),
        "w3p": w3p, "b3p": b3p,
    }
    if head["fuse_fc1"]:
        head["w1"] = w1.astype(jnp.bfloat16)
    else:
        head["w1i"] = w1[:E].astype(jnp.bfloat16)
        head["w1t"] = w1[E:].astype(jnp.bfloat16)
    return head


# ----------------------------------------------------------------------------
# Pallas-call wrapper
# ----------------------------------------------------------------------------
def mlp_head(img_feat, txt_feat, head, *, block_b=512):
    """img_feat/txt_feat: (B, E). Returns (B, n_out) float32 logits."""
    B, E = img_feat.shape
    assert E == head["E"]
    n_out, n_pad = head["n_out"], head["n_pad"]

    img_bf = img_feat.astype(jnp.bfloat16)
    txt_bf = txt_feat.astype(jnp.bfloat16)

    # Batch tile: large enough to amortize ~0.35us/step pipeline overhead, but
    # chosen so the grid has >=2 steps whenever B allows (v7x megacore sharding).
    tb = max(SUBLANES_BF16,
             min(block_b, _round_up(max(1, (B + 1) // 2), SUBLANES_BF16)))

    if B < tb:
        # Tiny batches only: pad up to a single tile.
        pad = tb - B
        img_bf = jnp.pad(img_bf, ((0, pad), (0, 0)))
        txt_bf = jnp.pad(txt_bf, ((0, pad), (0, 0)))
        bp = tb
    else:
        # No host pad: ragged last block reads junk rows; its writes are masked
        # and the wrapper slices to [:B] anyway.
        bp = B

    grid = (pl.cdiv(bp, tb),)

    def batch_spec(shape):
        return pl.BlockSpec(shape, lambda i: (i, 0))

    def resident(shape):
        # Constant index_map -> DMA'd once, stays resident in VMEM across tiles.
        # TODO(synk): pl.Buffered(1) on these would halve the weights' VMEM
        # footprint (v7x headroom at real CLIP E); left at default depth.
        return pl.BlockSpec(shape, lambda i: (0, 0))

    if head["fuse_fc1"]:
        # Small E: one lane-dense (bp, 2E) operand; the concat is tiny here.
        feat = jnp.concatenate([img_bf, txt_bf], axis=1)
        kernel = _mlp_head_kernel_fused
        operands = (feat, head["w1"], head["b1"], head["w2"], head["b2"],
                    head["w3p"], head["b3p"])
        in_specs = [batch_spec((tb, 2 * E)),
                    resident(head["w1"].shape), resident(head["b1"].shape),
                    resident(head["w2"].shape), resident(head["b2"].shape),
                    resident(head["w3p"].shape), resident(head["b3p"].shape)]
        act_bytes = feat.size * 2
        w_bytes = ((head["w1"].size + head["w2"].size + head["w3p"].size) * 2
                   + (head["b1"].size + head["b2"].size + head["b3p"].size) * 4)
    else:
        kernel = _mlp_head_kernel_split
        operands = (img_bf, txt_bf, head["w1i"], head["w1t"], head["b1"],
                    head["w2"], head["b2"], head["w3p"], head["b3p"])
        in_specs = [batch_spec((tb, E)), batch_spec((tb, E)),
                    resident(head["w1i"].shape), resident(head["w1t"].shape),
                    resident(head["b1"].shape),
                    resident(head["w2"].shape), resident(head["b2"].shape),
                    resident(head["w3p"].shape), resident(head["b3p"].shape)]
        act_bytes = (img_bf.size + txt_bf.size) * 2
        w_bytes = ((head["w1i"].size + head["w1t"].size + head["w2"].size
                    + head["w3p"].size) * 2
                   + (head["b1"].size + head["b2"].size + head["b3p"].size) * 4)

    flops = 2 * bp * (2 * E * 512 + 512 * 128 + 128 * n_pad)
    out_bytes = bp * n_pad * 2  # bf16 output

    out = pl.pallas_call(
        kernel,
        out_shape=jax.ShapeDtypeStruct((bp, n_pad), jnp.bfloat16),
        grid=grid,
        in_specs=in_specs,
        out_specs=batch_spec((tb, n_pad)),
        compiler_params=pltpu.CompilerParams(
            dimension_semantics=("parallel",),          # megacore-shard batch (v7x)
            vmem_limit_bytes=48 * 1024 * 1024),         # above v5e's 16 MiB default
        cost_estimate=pl.CostEstimate(
            flops=flops, transcendentals=0,
            bytes_accessed=act_bytes + w_bytes + out_bytes),
    )(*operands)

    return out[:B, :n_out].astype(jnp.float32)


# ----------------------------------------------------------------------------
# Deterministic stand-in "encoders" (frozen / no-grad in the torch module)
# ----------------------------------------------------------------------------
def encode_image_stub(image_nchw, proj):
    # image: (B, 3, H, W) NCHW -> flatten -> bf16 linear projection (f32 acc) to E
    B = image_nchw.shape[0]
    flat = image_nchw.reshape(B, -1).astype(jnp.bfloat16)
    feat = jnp.dot(flat, proj.astype(jnp.bfloat16),
                   preferred_element_type=jnp.float32)
    return feat.astype(jnp.bfloat16)                               # (B, E)


def encode_text_stub(text_tokens, embed_table):
    # text: (B, S) int32 token ids -> mean-pooled embedding lookup
    emb = embed_table[text_tokens]                                 # (B, S, E)
    return jnp.mean(emb, axis=1).astype(jnp.bfloat16)              # (B, E)


# ----------------------------------------------------------------------------
# Full forward pass mirroring TextImageClassifier.forward
# ----------------------------------------------------------------------------
def text_image_classifier_forward(image, text, params, head=None):
    if head is None:
        head = prepare_head_params(params)
    img_feat = encode_image_stub(image, params["img_proj"])
    txt_feat = encode_text_stub(text, params["txt_embed"])
    return mlp_head(img_feat, txt_feat, head)


def init_params(key, embedding_size, img_flat_dim, vocab_size):
    ks = jax.random.split(key, 8)
    scale = 0.02
    # Linear layers stored as (in, out): y = x @ W + b  (== torch x @ W_t.T + b)
    return {
        "img_proj":  scale * jax.random.normal(ks[0], (img_flat_dim, embedding_size), jnp.float32),
        "txt_embed": scale * jax.random.normal(ks[1], (vocab_size, embedding_size), jnp.float32),
        "w1": scale * jax.random.normal(ks[2], (embedding_size * 2, 512), jnp.float32),
        "b1": scale * jax.random.normal(ks[3], (1, 512), jnp.float32),
        "w2": scale * jax.random.normal(ks[4], (512, 128), jnp.float32),
        "b2": scale * jax.random.normal(ks[5], (1, 128), jnp.float32),
        "w3": scale * jax.random.normal(ks[6], (128, 2), jnp.float32),
        "b3": scale * jax.random.normal(ks[7], (1, 2), jnp.float32),
    }


def _ref_mlp_head(img_feat, txt_feat, p):
    """Pure-JAX reference matching the kernel's bf16/f32 quantization points."""
    E = img_feat.shape[1]
    f32 = jnp.float32
    img = img_feat.astype(jnp.bfloat16).astype(f32)
    txt = txt_feat.astype(jnp.bfloat16).astype(f32)
    w1i = p["w1"][:E].astype(jnp.bfloat16).astype(f32)
    w1t = p["w1"][E:].astype(jnp.bfloat16).astype(f32)
    w2 = p["w2"].astype(jnp.bfloat16).astype(f32)
    w3 = p["w3"].astype(jnp.bfloat16).astype(f32)
    h = jnp.maximum(img @ w1i + txt @ w1t + p["b1"].astype(f32), 0.0)
    h = h.astype(jnp.bfloat16).astype(f32)
    h = jnp.maximum(h @ w2 + p["b2"].astype(f32), 0.0)
    h = h.astype(jnp.bfloat16).astype(f32)
    out = h @ w3 + p["b3"].astype(f32)
    return out.astype(jnp.bfloat16).astype(f32)   # kernel emits bf16 logits


if __name__ == "__main__":
    key = jax.random.PRNGKey(0)
    k_img, k_txt, k_par = jax.random.split(key, 3)

    # --- demo shapes (stub encoders, small E -> fused-fc1 kernel path) -------
    B, C, H, W = 2, 3, 16, 16          # small NCHW image
    S = 8                              # text sequence length
    E = 32                             # embedding_size (small stand-in for CLIP's)
    VOCAB = 64

    image = jax.random.normal(k_img, (B, C, H, W), jnp.float32)
    text = jax.random.randint(k_txt, (B, S), 0, VOCAB, jnp.int32)
    params = init_params(k_par, E, C * H * W, VOCAB)
    head = prepare_head_params(params)            # weight prep hoisted (done once)

    out = text_image_classifier_forward(image, text, params, head)
    jax.block_until_ready(out)
    assert out.shape == (B, 2) and out.dtype == jnp.float32

    img_feat = encode_image_stub(image, params["img_proj"])
    txt_feat = encode_text_stub(text, params["txt_embed"])
    ref = _ref_mlp_head(img_feat, txt_feat, params)
    assert jnp.allclose(out, ref, atol=5e-3, rtol=5e-3), (
        f"max abs err {jnp.max(jnp.abs(out - ref))}")

    # --- second smoke test: split-W1 path (E >= 128), multi-step ragged grid --
    kf = jax.random.split(key, 8)
    B2, E2 = 40, 256
    p2 = {
        "w1": 0.02 * jax.random.normal(kf[0], (2 * E2, 512), jnp.float32),
        "b1": 0.02 * jax.random.normal(kf[1], (1, 512), jnp.float32),
        "w2": 0.02 * jax.random.normal(kf[2], (512, 128), jnp.float32),
        "b2": 0.02 * jax.random.normal(kf[3], (1, 128), jnp.float32),
        "w3": 0.02 * jax.random.normal(kf[4], (128, 2), jnp.float32),
        "b3": 0.02 * jax.random.normal(kf[5], (1, 2), jnp.float32),
    }
    if2 = jax.random.normal(kf[6], (B2, E2), jnp.float32).astype(jnp.bfloat16)
    tf2 = jax.random.normal(kf[7], (B2, E2), jnp.float32).astype(jnp.bfloat16)
    head2 = prepare_head_params(p2)
    out2 = mlp_head(if2, tf2, head2, block_b=512)
    jax.block_until_ready(out2)
    ref2 = _ref_mlp_head(if2, tf2, p2)
    assert out2.shape == (B2, 2)
    assert jnp.allclose(out2, ref2, atol=5e-3, rtol=5e-3), (
        f"max abs err {jnp.max(jnp.abs(out2 - ref2))}")

    print("KERNEL_OK")
</pallas_src>

<mosaic_0001>
module attributes {stable_mosaic.version = 11 : i64} {
  func.func @_mlp_head_kernel_fused(%arg0: i32, %arg1: memref<16x64xbf16, #tpu.memory_space<vmem>>, %arg2: memref<64x512xbf16, #tpu.memory_space<vmem>>, %arg3: memref<1x512xf32, #tpu.memory_space<vmem>>, %arg4: memref<512x128xbf16, #tpu.memory_space<vmem>>, %arg5: memref<1x128xf32, #tpu.memory_space<vmem>>, %arg6: memref<128x128xbf16, #tpu.memory_space<vmem>>, %arg7: memref<1x128xf32, #tpu.memory_space<vmem>>, %arg8: memref<16x128xbf16, #tpu.memory_space<vmem>>) attributes {dimension_semantics = [#tpu.dimension_semantics<parallel>], iteration_bounds = array<i64: 1>, scalar_prefetch = 0 : i64, scratch_operands = 0 : i64, tpu.core_type = #tpu.core_type<tc>, window_params = [{transform_indices = @transform_0, window_bounds = array<i64: 16, 64>}, {pipeline_mode = #tpu.pipeline_mode<synchronous>, transform_indices = @transform_1, window_bounds = array<i64: 64, 512>}, {pipeline_mode = #tpu.pipeline_mode<synchronous>, transform_indices = @transform_2, window_bounds = array<i64: 1, 512>}, {pipeline_mode = #tpu.pipeline_mode<synchronous>, transform_indices = @transform_3, window_bounds = array<i64: 512, 128>}, {pipeline_mode = #tpu.pipeline_mode<synchronous>, transform_indices = @transform_4, window_bounds = array<i64: 1, 128>}, {pipeline_mode = #tpu.pipeline_mode<synchronous>, transform_indices = @transform_5, window_bounds = array<i64: 128, 128>}, {pipeline_mode = #tpu.pipeline_mode<synchronous>, transform_indices = @transform_6, window_bounds = array<i64: 1, 128>}, {transform_indices = @transform_7, window_bounds = array<i64: 16, 128>}]} {
    %c0 = arith.constant 0 : index
    %c0_0 = arith.constant 0 : index
    %0 = vector.load %arg1[%c0, %c0_0] : memref<16x64xbf16, #tpu.memory_space<vmem>>, vector<16x64xbf16>
    %c0_1 = arith.constant 0 : index
    %c0_2 = arith.constant 0 : index
    %1 = vector.load %arg2[%c0_1, %c0_2] : memref<64x512xbf16, #tpu.memory_space<vmem>>, vector<64x512xbf16>
    %cst = arith.constant dense<0.000000e+00> : vector<16x512xf32>
    %2 = tpu.matmul %0, %1, %cst {dimension_numbers = #tpu.dot_dimension_numbers<[1], [0], [0], [1], [0, 0, 1, 1], [], []>} : vector<16x64xbf16>, vector<64x512xbf16>, vector<16x512xf32> -> vector<16x512xf32>
    %c0_3 = arith.constant 0 : index
    %c0_4 = arith.constant 0 : index
    %3 = vector.load %arg3[%c0_3, %c0_4] : memref<1x512xf32, #tpu.memory_space<vmem>>, vector<1x512xf32>
    %4 = vector.broadcast %3 : vector<1x512xf32> to vector<16x512xf32>
    %5 = arith.addf %2, %4 : vector<16x512xf32>
    %cst_5 = arith.constant 0.000000e+00 : f32
    %6 = vector.broadcast %cst_5 : f32 to vector<16x512xf32>
    %7 = arith.maximumf %5, %6 : vector<16x512xf32>
    %8 = arith.truncf %7 : vector<16x512xf32> to vector<16x512xbf16>
    %c0_6 = arith.constant 0 : index
    %c0_7 = arith.constant 0 : index
    %9 = vector.load %arg4[%c0_6, %c0_7] : memref<512x128xbf16, #tpu.memory_space<vmem>>, vector<512x128xbf16>
    %cst_8 = arith.constant dense<0.000000e+00> : vector<16x128xf32>
    %10 = tpu.matmul %8, %9, %cst_8 {dimension_numbers = #tpu.dot_dimension_numbers<[1], [0], [0], [1], [0, 0, 1, 1], [], []>} : vector<16x512xbf16>, vector<512x128xbf16>, vector<16x128xf32> -> vector<16x128xf32>
    %c0_9 = arith.constant 0 : index
    %c0_10 = arith.constant 0 : index
    %11 = vector.load %arg5[%c0_9, %c0_10] : memref<1x128xf32, #tpu.memory_space<vmem>>, vector<1x128xf32>
    %12 = vector.broadcast %11 : vector<1x128xf32> to vector<16x128xf32>
    %13 = arith.addf %10, %12 : vector<16x128xf32>
    %cst_11 = arith.constant 0.000000e+00 : f32
    %14 = vector.broadcast %cst_11 : f32 to vector<16x128xf32>
    %15 = arith.maximumf %13, %14 : vector<16x128xf32>
    %16 = arith.truncf %15 : vector<16x128xf32> to vector<16x128xbf16>
    %c0_12 = arith.constant 0 : index
    %c0_13 = arith.constant 0 : index
    %17 = vector.load %arg6[%c0_12, %c0_13] : memref<128x128xbf16, #tpu.memory_space<vmem>>, vector<128x128xbf16>
    %cst_14 = arith.constant dense<0.000000e+00> : vector<16x128xf32>
    %18 = tpu.matmul %16, %17, %cst_14 {dimension_numbers = #tpu.dot_dimension_numbers<[1], [0], [0], [1], [0, 0, 1, 1], [], []>} : vector<16x128xbf16>, vector<128x128xbf16>, vector<16x128xf32> -> vector<16x128xf32>
    %c0_15 = arith.constant 0 : index
    %c0_16 = arith.constant 0 : index
    %19 = vector.load %arg7[%c0_15, %c0_16] : memref<1x128xf32, #tpu.memory_space<vmem>>, vector<1x128xf32>
    %20 = vector.broadcast %19 : vector<1x128xf32> to vector<16x128xf32>
    %21 = arith.addf %18, %20 : vector<16x128xf32>
    %22 = arith.truncf %21 : vector<16x128xf32> to vector<16x128xbf16>
    %c0_17 = arith.constant 0 : index
    %c0_18 = arith.constant 0 : index
    %23 = vector.load %arg8[%c0_17, %c0_18] : memref<16x128xbf16, #tpu.memory_space<vmem>>, vector<16x128xbf16>
    tpu.vector_store %arg8[%c0_17, %c0_18], %22 {strides = array<i32>} : memref<16x128xbf16, #tpu.memory_space<vmem>>, vector<16x128xbf16>,
    return
  }
  func.func @transform_0(%arg0: i32) -> (i32, i32) {
    %c0_i32 = arith.constant 0 : i32
    %c0_i32_0 = arith.constant 0 : i32
    return %arg0, %c0_i32 : i32, i32
  }
  func.func @transform_1(%arg0: i32) -> (i32, i32) {
    %c0_i32 = arith.constant 0 : i32
    %c0_i32_0 = arith.constant 0 : i32
    %c0_i32_1 = arith.constant 0 : i32
    return %c0_i32, %c0_i32_0 : i32, i32
  }
  func.func @transform_2(%arg0: i32) -> (i32, i32) {
    %c0_i32 = arith.constant 0 : i32
    %c0_i32_0 = arith.constant 0 : i32
    %c0_i32_1 = arith.constant 0 : i32
    return %c0_i32, %c0_i32_0 : i32, i32
  }
  func.func @transform_3(%arg0: i32) -> (i32, i32) {
    %c0_i32 = arith.constant 0 : i32
    %c0_i32_0 = arith.constant 0 : i32
    %c0_i32_1 = arith.constant 0 : i32
    return %c0_i32, %c0_i32_0 : i32, i32
  }
  func.func @transform_4(%arg0: i32) -> (i32, i32) {
    %c0_i32 = arith.constant 0 : i32
    %c0_i32_0 = arith.constant 0 : i32
    %c0_i32_1 = arith.constant 0 : i32
    return %c0_i32, %c0_i32_0 : i32, i32
  }
  func.func @transform_5(%arg0: i32) -> (i32, i32) {
    %c0_i32 = arith.constant 0 : i32
    %c0_i32_0 = arith.constant 0 : i32
    %c0_i32_1 = arith.constant 0 : i32
    return %c0_i32, %c0_i32_0 : i32, i32
  }
  func.func @transform_6(%arg0: i32) -> (i32, i32) {
    %c0_i32 = arith.constant 0 : i32
    %c0_i32_0 = arith.constant 0 : i32
    %c0_i32_1 = arith.constant 0 : i32
    return %c0_i32, %c0_i32_0 : i32, i32
  }
  func.func @transform_7(%arg0: i32) -> (i32, i32) {
    %c0_i32 = arith.constant 0 : i32
    %c0_i32_0 = arith.constant 0 : i32
    return %arg0, %c0_i32 : i32, i32
  }
}

</mosaic_0001>

<bundles_post_ra>
// kernel: tpu_custom_call.1
= control target key start
LH: loop header
LB: loop body
LE: loop exit
PB: predicated region body
PF: predicated region fallthrough
CT: control target
= control target key end

     0   :  { %12 = vsyncpa [#allocation3], 0  ;;  %s1288_s0 = inlined_call_operand.hbm [shape: bf16[16,64], index: 0, kind: input, shape index: {}]   ;;  %s1289_s1 = inlined_call_operand.hbm [shape: bf16[64,512], index: 1, kind: input, shape index: {}]   ;;  %s1290_s2 = inlined_call_operand.vmem [shape: f32[1,512], index: 2, kind: input, shape index: {}]   ;;  %s1291_s3 = inlined_call_operand.hbm [shape: bf16[512,128], index: 3, kind: input, shape index: {}]   ;;  %s1292_s4 = inlined_call_operand.vmem [shape: f32[1,128], index: 4, kind: input, shape index: {}]   ;;  %s1293_s5 = inlined_call_operand.hbm [shape: bf16[128,128], index: 5, kind: input, shape index: {}]   ;;  %s1294_s6 = inlined_call_operand.vmem [shape: f32[1,128], index: 6, kind: input, shape index: {}]   ;;  %s1295_s7 = inlined_call_operand.hbm [shape: bf16[16,128], index: 7, kind: output, shape index: {}]  }
   0x1   :  { %13 = vsyncpa [#allocation6], 0 }
   0x2   :  { %14 = vsyncpa [#allocation9], 0 }
   0x3   :  { %15 = vsyncpa [#allocation4], 0  ;;  %s1137_s24 = smov [#allocation5]   ;;  %s1019_s28 = scalar_lea.hbm %s1289_s1, 2048 }
   0x4   :  { %s33_s25 = sshll.u32 %s1137_s24, 4  ;;  %p1020_p0 = scmp.ne.s32.totalorder %s1289_s1, %s1019_s28  ;;  %s34_s25 = int_to_ptr.vmem [resolvable:$true] %s33_s25 }
   0x5   :  { %p1023_p1 = scmp.lt.u32.totalorder %s1019_s28, %s1289_s1 }
   0x7   :  { %p1025_p2 = pnand %p1023_p1, %p1020_p0 }
   0x9   :  { %1028 = shalt.err (!%p1025_p2)
}
   0xa   :  { %s1029_s10 = scalar_lea.vmem %s34_s25, 2048  ;;  %p1034_p4 = scmp.lt.s32.totalorder %s34_s25, %s34_s25 }
   0xb   :  { %p1030_p3 = scmp.ne.s32.totalorder %s34_s25, %s1029_s10  ;;  %p1035_p5 = scmp.lt.s32.totalorder %s1029_s10, %s1029_s10 }
   0xd   :  { %p1036_p6 = por %p1035_p5, %p1034_p4 }
   0xf   :  { %p1037_p7 = pnand %p1036_p6, %p1030_p3 }
  0x11   :  { %1040 = shalt.err (!%p1037_p7)
}
  0x12   :  { %s1138_s11 = smov 256   ;;  %s1139_s12 = smov 16  }
  0x13   :  { %39 = dma.hbm_to_vmem [thread:$0]  %s1289_s1, 2048, %s34_s25, [#allocation6], %s1138_s11, %s1138_s11, %s1139_s12  }
  0x14   :  { %s1140_s15 = smov [#allocation2]   ;;  %s1041_s19 = scalar_lea.hbm %s1288_s0, 128 }
  0x15   :  { %s21_s16 = sshll.u32 %s1140_s15, 4  ;;  %p1042_p8 = scmp.ne.s32.totalorder %s1288_s0, %s1041_s19  ;;  %s22_s16 = int_to_ptr.vmem [resolvable:$true] %s21_s16 }
  0x16   :  { %p1045_p9 = scmp.lt.u32.totalorder %s1041_s19, %s1288_s0 }
  0x18   :  { %p1047_p10 = pnand %p1045_p9, %p1042_p8 }
  0x1a   :  { %1050 = shalt.err (!%p1047_p10)
}
  0x1b   :  { %s1051_s24 = scalar_lea.vmem %s22_s16, 128  ;;  %p1056_p12 = scmp.lt.s32.totalorder %s22_s16, %s22_s16 }
  0x1c   :  { %p1052_p11 = scmp.ne.s32.totalorder %s22_s16, %s1051_s24  ;;  %p1057_p13 = scmp.lt.s32.totalorder %s1051_s24, %s1051_s24 }
  0x1e   :  { %p1058_p0 = por %p1057_p13, %p1056_p12 }
  0x20   :  { %p1059_p1 = pnand %p1058_p0, %p1052_p11 }
  0x22   :  { %1062 = shalt.err (!%p1059_p1)
}
  0x23   :  { %s1141_s1 = smov 64   ;;  %s1142_s25 = smov 4  }
  0x24   :  { %27 = dma.hbm_to_vmem [thread:$0]  %s1288_s0, 128, %s22_s16, [#allocation3], %s1141_s1, %s1141_s1, %s1142_s25  }
  0x25   :  { %s1143_s28 = smov [#allocation7]   ;;  %s1144_s30 = smov [#allocation8]  }
  0x26   :  { %s47_s29 = sshll.u32 %s1143_s28, 4  ;;  %s61_s8 = sshll.u32 %s1144_s30, 4  ;;  %s48_s29 = int_to_ptr.vmem [resolvable:$true] %s47_s29  ;;  %s1216_s8 = int_to_ptr.vmem [resolvable:$true] %s61_s8 }
  0x27   :  { %s1063_s11 = scalar_lea.hbm %s1291_s3, 4096 }
  0x28   :  { %p1064_p2 = scmp.ne.s32.totalorder %s1291_s3, %s1063_s11  ;;  %p1067_p3 = scmp.lt.u32.totalorder %s1063_s11, %s1291_s3 }
  0x2a   :  { %p1069_p4 = pnand %p1067_p3, %p1064_p2 }
  0x2c   :  { %1072 = shalt.err (!%p1069_p4)
}
  0x2d   :  { %s1073_s0 = scalar_lea.vmem %s48_s29, 4096  ;;  %p1078_p6 = scmp.lt.s32.totalorder %s48_s29, %s48_s29 }
  0x2e   :  { %p1074_p5 = scmp.ne.s32.totalorder %s48_s29, %s1073_s0  ;;  %p1079_p7 = scmp.lt.s32.totalorder %s1073_s0, %s1073_s0 }
  0x30   :  { %p1080_p8 = por %p1079_p7, %p1078_p6 }
  0x32   :  { %p1081_p9 = pnand %p1080_p8, %p1074_p5 }
  0x34   :  { %1084 = shalt.err (!%p1081_p9)
}
  0x35   :  { %53 = dma.hbm_to_vmem [thread:$0]  %s1291_s3, 4096, %s48_s29, [#allocation6], %s1141_s1, %s1141_s1, %s1142_s25  }
  0x36   :  { %s1085_s20 = scalar_lea.hbm %s1293_s5, 1024 }
  0x37   :  { %p1086_p10 = scmp.ne.s32.totalorder %s1293_s5, %s1085_s20  ;;  %p1089_p11 = scmp.lt.u32.totalorder %s1085_s20, %s1293_s5 }
  0x39   :  { %p1091_p12 = pnand %p1089_p11, %p1086_p10 }
  0x3b   :  { %1094 = shalt.err (!%p1091_p12)
}
  0x3c   :  { %s1095_s26 = scalar_lea.vmem %s1216_s8, 1024  ;;  %p1100_p0 = scmp.lt.s32.totalorder %s1216_s8, %s1216_s8 }
  0x3d   :  { %p1096_p13 = scmp.ne.s32.totalorder %s1216_s8, %s1095_s26  ;;  %p1101_p1 = scmp.lt.s32.totalorder %s1095_s26, %s1095_s26 }
  0x3f   :  { %p1102_p2 = por %p1101_p1, %p1100_p0 }
  0x41   :  { %p1103_p3 = pnand %p1102_p2, %p1096_p13 }
  0x43   :  { %1106 = shalt.err (!%p1103_p3)
}
  0x44   :  { %67 = dma.hbm_to_vmem [thread:$0]  %s1293_s5, 1024, %s1216_s8, [#allocation9], %s1141_s1, %s1141_s1, %s1142_s25  }
  0x45   :  { %1129 = dma.done.wait [#allocation3], 128  }
  0x46   :  { %1130 = vsyncadd [#allocation3], 4294967168 }
  0x47   :  { %1131 = dma.done.wait [#allocation6], 6144  }
  0x48   :  { %1132 = vsyncadd [#allocation6], 4294961152 }
  0x49   :  { %1133 = dma.done.wait [#allocation9], 1024  }
  0x4a   :  { %1134 = vsyncadd [#allocation9], 4294966272  ;;  %v1145_v0 = vmov 0   ;;  %v954_v1 = vld [vmem:[#allocation5 + $0x4] ss:$16 sps:$4 sm:$0xff]   ;;  %v966_v10 = vld [vmem:[#allocation2] sm:$0xff]   ;;  %v103_v51 = vlaneseq }
  0x4b   :  { %244 = vmatprep.mubr.bf16.mxu1 %v1145_v0  ;;  %v956_v2 = vld [vmem:[#allocation5] ss:$16 sps:$4 sm:$0xff]   ;;  %212 = vmatprep.subr.bf16.mxu1 %v954_v1  ;;  %v957_v3 = vld [vmem:[#allocation5 + $0x24] ss:$16 sps:$4 sm:$0xff]   ;;  %v969_v9 = vld [vmem:[#allocation5 + $0xc] ss:$16 sps:$4 sm:$0xff]  }
  0x4c   :  { %213 = vmatpush1.bf16.msra.mxu1 %v956_v2  ;;  %v959_v4 = vld [vmem:[#allocation5 + $0x20] ss:$16 sps:$4 sm:$0xff]   ;;  %v960_v5 = vld [vmem:[#allocation5 + $0x44] ss:$16 sps:$4 sm:$0xff]   ;;  %v967_v12 = vld [vmem:[#allocation5 + $0x8] ss:$16 sps:$4 sm:$0xff]  }
  0x4d   :  { %214 = vmatprep.subr.bf16.mxu1 %v957_v3  ;;  %v962_v6 = vld [vmem:[#allocation5 + $0x40] ss:$16 sps:$4 sm:$0xff]   ;;  %v963_v7 = vld [vmem:[#allocation5 + $0x64] ss:$16 sps:$4 sm:$0xff]   ;;  %vm208_vm0 = vcmask 523264   ;;  %v981_v14 = vld [vmem:[#allocation7 + $0x48] sm:$0xff]  }
  0x4e   :  { %v965_v8 = vld [vmem:[#allocation5 + $0x60] ss:$16 sps:$4 sm:$0xff]   ;;  %v972_v15 = vld [vmem:[#allocation5 + $0x2c] ss:$16 sps:$4 sm:$0xff]   ;;  %v970_v18 = vld [vmem:[#allocation5 + $0x28] ss:$16 sps:$4 sm:$0xff]  }
  0x4f   :  { %v979_v11 = vld [vmem:[#allocation7 + $0x40] sm:$0xff]   ;;  %v982_v16 = vld [vmem:[#allocation7 + $0x8] sm:$0xff]   ;;  %v983_v17 = vld [vmem:[#allocation7 + $0x50] sm:$0xff]   ;;  %v1146_v50 = vmov 0.0   ;;  %v104_v52 = vshrl.u32 %v103_v51, 7  ;;  %vm1147_vm1 = vmmov 0  }
  0x50   :  { %215 = vmatpush1.bf16.msra.mxu1 %v959_v4  ;;  %v980_v13 = vld [vmem:[#allocation7] sm:$0xff]   ;;  %869 = vmatprep.subr.bf16.mxu0 %v979_v11  ;;  %v975_v19 = vld [vmem:[#allocation5 + $0x4c] ss:$16 sps:$4 sm:$0xff]   ;;  %v984_v20 = vld [vmem:[#allocation7 + $0x10] sm:$0xff]  }
  0x51   :  { %216 = vmatprep.subr.bf16.mxu1 %v960_v5  ;;  %870 = vmatpush3.bf16.msra.mxu0 %v980_v13  ;;  %v985_v21 = vld [vmem:[#allocation7 + $0x58] sm:$0xff]   ;;  %v987_v26 = vld [vmem:[#allocation7 + $0x60] sm:$0xff]   ;;  %v991_v29 = vld [vmem:[#allocation7 + $0x68] sm:$0xff]   ;;  %v105_v53 = vsub.s32 0, %v104_v52  ;;  %v109_v55 = vsub.s32 1, %v104_v52 }
  0x52   :  { %871 = vmatprep.subr.bf16.mxu0 %v981_v14  ;;  %v973_v22 = vld [vmem:[#allocation5 + $0x48] ss:$16 sps:$4 sm:$0xff]   ;;  %v978_v23 = vld [vmem:[#allocation5 + $0x6c] ss:$16 sps:$4 sm:$0xff]   ;;  %v988_v27 = vld [vmem:[#allocation7 + $0xc0] sm:$0xff]  }
  0x53   :  { %v986_v24 = vld [vmem:[#allocation7 + $0x18] sm:$0xff]   ;;  %v989_v28 = vld [vmem:[#allocation7 + $0x20] sm:$0xff]   ;;  %v992_v31 = vld [vmem:[#allocation7 + $0xc8] sm:$0xff]  }
  0x54   :  { %217 = vmatpush1.bf16.msra.mxu1 %v962_v6  ;;  %v976_v25 = vld [vmem:[#allocation5 + $0x68] ss:$16 sps:$4 sm:$0xff]   ;;  %v990_v30 = vld [vmem:[#allocation7 + $0x80] sm:$0xff]   ;;  %v995_v34 = vld [vmem:[#allocation7 + $0x70] sm:$0xff]  }
  0x55   :  { %218 = vmatprep.subr.bf16.mxu1 %v963_v7  ;;  %872 = vmatpush3.bf16.msra.mxu0 %v982_v16  ;;  %v993_v32 = vld [vmem:[#allocation7 + $0x28] sm:$0xff]   ;;  %v996_v35 = vld [vmem:[#allocation7 + $0xd0] sm:$0xff]   ;;  %v999_v38 = vld [vmem:[#allocation7 + $0x78] sm:$0xff]  }
  0x56   :  { %873 = vmatprep.subr.bf16.mxu0 %v983_v17  ;;  %v994_v33 = vld [vmem:[#allocation7 + $0x88] sm:$0xff]   ;;  %v997_v36 = vld [vmem:[#allocation7 + $0x30] sm:$0xff]   ;;  %v1000_v39 = vld [vmem:[#allocation7 + $0xd8] sm:$0xff]  }
  0x57   :  { %v998_v37 = vld [vmem:[#allocation7 + $0x90] sm:$0xff]   ;;  %v1001_v40 = vld [vmem:[#allocation7 + $0x38] sm:$0xff]   ;;  %v1003_v42 = vld [vmem:[#allocation7 + $0xe0] sm:$0xff]  }
  0x58   :  { %219 = vmatpush1.bf16.msra.mxu1 %v965_v8  ;;  %v1002_v41 = vld [vmem:[#allocation7 + $0x98] sm:$0xff]   ;;  %v1004_v43 = vld [vmem:[#allocation7 + $0xa0] sm:$0xff]   ;;  %v1005_v44 = vld [vmem:[#allocation7 + $0xe8] sm:$0xff]  }
  0x59   :  { %255 = vmatprep.subr.bf16.mxu1 %v969_v9  ;;  %874 = vmatpush3.bf16.msra.mxu0 %v984_v20  ;;  %v1006_v45 = vld [vmem:[#allocation7 + $0xa8] sm:$0xff]   ;;  %v1007_v46 = vld [vmem:[#allocation7 + $0xf0] sm:$0xff]   ;;  %v1009_v48 = vld [vmem:[#allocation7 + $0xf8] sm:$0xff]   ;;  %v113_v9 = vsub.s32 2, %v104_v52 }
  0x5a   :  { %875 = vmatprep.subr.bf16.mxu0 %v985_v21  ;;  %v1008_v47 = vld [vmem:[#allocation7 + $0xb0] sm:$0xff]   ;;  %v1010_v49 = vld [vmem:[#allocation7 + $0xb8] sm:$0xff]   ;;  %v1011_v8 = vld [vmem:[#allocation8] sm:$0xff]  }
  0x5b   :  { %816 = vmatmul.mubr.msk.bf16.vlgmr.msra.gmra.mrb[0].mxu1 %vm208_vm0, %v966_v10  ;;  %v101_v54 = vld [vmem:[%s1290_s2] sm:$0xf] }
  0x5c   :  { %256 = vmatpush1.bf16.msra.mxu1 %v967_v12  ;;  %287 = vmatprep.mubr.bf16.mxu1 %v1145_v0  ;;  %v106_v56 = vrot.slane %v101_v54, %v105_v53  ;;  %v110_v57 = vrot.slane %v101_v54, %v109_v55  ;;  %v114_v11 = vrot.slane %v101_v54, %v113_v9 }
  0x5d   :  { %257 = vmatprep.subr.bf16.mxu1 %v972_v15  ;;  %876 = vmatpush3.bf16.msra.mxu0 %v986_v24 }
  0x5e   :  { %877 = vmatprep.subr.bf16.mxu0 %v987_v26 }
  0x60   :  { %258 = vmatpush1.bf16.msra.mxu1 %v970_v18 }
  0x61   :  { %259 = vmatprep.subr.bf16.mxu1 %v975_v19  ;;  %878 = vmatpush3.bf16.msra.mxu0 %v989_v28  ;;  %v1013_v28 = vld [vmem:[#allocation8 + $0x10] sm:$0xff]  }
  0x62   :  { %879 = vmatprep.subr.bf16.mxu0 %v991_v29  ;;  %v1014_v29 = vld [vmem:[#allocation8 + $0x18] sm:$0xff]  }
  0x64   :  { %260 = vmatpush1.bf16.msra.mxu1 %v973_v22 }
  0x65   :  { %261 = vmatprep.subr.bf16.mxu1 %v978_v23  ;;  %880 = vmatpush3.bf16.msra.mxu0 %v993_v32  ;;  %v1017_v32 = vld [vmem:[#allocation8 + $0x30] sm:$0xff]  }
  0x66   :  { %881 = vmatprep.subr.bf16.mxu0 %v995_v34 }
  0x68   :  { %262 = vmatpush1.bf16.msra.mxu1 %v976_v25 }
  0x69   :  { %891 = vmatprep.subr.bf16.mxu1 %v988_v27  ;;  %882 = vmatpush3.bf16.msra.mxu0 %v997_v36  ;;  %v1012_v27 = vld [vmem:[#allocation8 + $0x8] sm:$0xff]  }
  0x6a   :  { %883 = vmatprep.subr.bf16.mxu0 %v999_v38 }
  0x6b   :  { %817 = vmatmul.mubr.msk.bf16.vlgmr.msra.gmra.mrb[4].mxu1 %vm208_vm0, %v966_v10  ;;  %v117_v10 = vsub.s32 3, %v104_v52 }
  0x6c   :  { %892 = vmatpush3.bf16.msra.mxu1 %v990_v30  ;;  %v1015_v30 = vld [vmem:[#allocation8 + $0x20] sm:$0xff]  }
  0x6d   :  { %893 = vmatprep.subr.bf16.mxu1 %v992_v31  ;;  %884 = vmatpush3.bf16.msra.mxu0 %v1001_v40  ;;  %v118_v12 = vrot.slane %v101_v54, %v117_v10  ;;  %v1016_v31 = vld [vmem:[#allocation8 + $0x28] sm:$0xff]   ;;  %v818_v40 = vld [vmem:[%s1292_s4] ss:$0 sm:$0xff]  ;;  %s1148_s4 = smov [#allocation10]  }
  0x6e   :  { %922 = vmatprep.subr.bf16.mxu0 %v1146_v50  ;;  %v851_v54 = vld [vmem:[%s1294_s6] ss:$0 sm:$0xff]  ;;  %s785_s9 = sshll.u32 %s1148_s4, 4  ;;  %s786_s9 = int_to_ptr.vmem [resolvable:$true] %s785_s9 }
  0x6f   :  { %s1107_s10 = scalar_lea.vmem %s786_s9, 128  ;;  %p1112_p5 = scmp.lt.s32.totalorder %s786_s9, %s786_s9 }
  0x70   :  { %894 = vmatpush3.bf16.msra.mxu1 %v994_v33  ;;  %v1018_v33 = vld [vmem:[#allocation8 + $0x38] sm:$0xff]   ;;  %p1108_p4 = scmp.ne.s32.totalorder %s786_s9, %s1107_s10  ;;  %p1113_p6 = scmp.lt.s32.totalorder %s1107_s10, %s1107_s10 }
  0x71   :  { %895 = vmatprep.subr.bf16.mxu1 %v996_v35 }
  0x72   :  { %p1114_p7 = por %p1113_p6, %p1112_p5 }
  0x74   :  { %896 = vmatpush3.bf16.msra.mxu1 %v998_v37  ;;  %p1115_p8 = pnand %p1114_p7, %p1108_p4 }
  0x75   :  { %897 = vmatprep.subr.bf16.mxu1 %v1000_v39 }
  0x78   :  { %898 = vmatpush3.bf16.msra.mxu1 %v1002_v41 }
  0x79   :  { %899 = vmatprep.subr.bf16.mxu1 %v1003_v42 }
  0x7c   :  { %900 = vmatpush3.bf16.msra.mxu1 %v1004_v43 }
  0x7d   :  { %901 = vmatprep.subr.bf16.mxu1 %v1005_v44 }
  0x80   :  { %902 = vmatpush3.bf16.msra.mxu1 %v1006_v45 }
  0x81   :  { %903 = vmatprep.subr.bf16.mxu1 %v1007_v46 }
  0x84   :  { %904 = vmatpush3.bf16.msra.mxu1 %v1008_v47 }
  0x85   :  { %905 = vmatprep.subr.bf16.mxu1 %v1009_v48 }
  0x88   :  { %906 = vmatpush3.bf16.msra.mxu1 %v1010_v49 }
 0x12e   :  { %v246_v58 = vpop.f32.mrb[0].mxu1 }
 0x12f   :  { %v247_v59 = vadd.f32 %v246_v58, %v106_v56  ;;  %v248_v60 = vpop.f32.mrb[1].mxu1 }
 0x130   :  { %v249_v61 = vadd.f32 %v248_v60, %v110_v57  ;;  %v250_v62 = vpop.f32.mrb[2].mxu1 }
 0x131   :  { %v298_v63 = vmax.f32 %v247_v59, 0.0  ;;  %v251_v0 = vadd.f32 %v250_v62, %v106_v56  ;;  %v252_v1 = vpop.f32.mrb[3].mxu1 }
 0x132   :  { %v253_v2 = vadd.f32 %v252_v1, %v110_v57  ;;  %v299_v4 = vmax.f32 %v249_v61, 0.0 }
 0x133   :  { %v302_v3 = vmax.f32 %v251_v0, 0.0 }
 0x134   :  { %v303_v5 = vmax.f32 %v253_v2, 0.0 }
 0x135   :  { %v306_v6 = vpack.c.bf16 %v302_v3, %v298_v63 }
 0x136   :  { %v307_v7 = vpack.c.bf16 %v303_v5, %v299_v4 }
 0x138   :  { %605 = vmatprep.mubr.bf16.mxu0 %v307_v7 }
 0x139   :  { %606 = vmatmul.mubr.bf16.vlgmr.msra.gmra.mrb[0].mxu0 %v306_v6 }
 0x13a   :  { %923 = vmatpush3.bf16.msra.mxu0 %v1011_v8  ;;  %938 = vmatprep.mubr.msk.bf16.mxu0 %vm1147_vm1, %v1146_v50 }
 0x13b   :  { %924 = vmatprep.subr.bf16.mxu0 %v1146_v50 }
 0x13e   :  { %v289_v13 = vpop.f32.mrb[4].mxu1  ;;  %925 = vmatpush3.bf16.msra.mxu0 %v1012_v27 }
 0x13f   :  { %v290_v14 = vadd.f32 %v289_v13, %v114_v11  ;;  %v291_v15 = vpop.f32.mrb[5].mxu1  ;;  %926 = vmatprep.subr.bf16.mxu0 %v1146_v50 }
 0x140   :  { %v292_v16 = vadd.f32 %v291_v15, %v118_v12  ;;  %v293_v17 = vpop.f32.mrb[6].mxu1 }
 0x141   :  { %v294_v18 = vadd.f32 %v293_v17, %v114_v11  ;;  %v295_v19 = vpop.f32.mrb[7].mxu1  ;;  %v300_v21 = vmax.f32 %v290_v14, 0.0 }
 0x142   :  { %v296_v20 = vadd.f32 %v295_v19, %v118_v12  ;;  %v301_v23 = vmax.f32 %v292_v16, 0.0  ;;  %927 = vmatpush3.bf16.msra.mxu0 %v1013_v28 }
 0x143   :  { %v304_v22 = vmax.f32 %v294_v18, 0.0  ;;  %928 = vmatprep.subr.bf16.mxu0 %v1146_v50 }
 0x144   :  { %v305_v24 = vmax.f32 %v296_v20, 0.0 }
 0x145   :  { %v308_v25 = vpack.c.bf16 %v304_v22, %v300_v21 }
 0x146   :  { %v309_v26 = vpack.c.bf16 %v305_v24, %v301_v23  ;;  %929 = vmatpush3.bf16.msra.mxu0 %v1014_v29 }
 0x147   :  { %930 = vmatprep.subr.bf16.mxu0 %v1146_v50 }
 0x148   :  { %646 = vmatprep.mubr.bf16.mxu1 %v309_v26 }
 0x149   :  { %647 = vmatmul.mubr.bf16.vlgmr.msra.gmra.mrb[8].mxu1 %v308_v25 }
 0x14a   :  { %931 = vmatpush3.bf16.msra.mxu0 %v1015_v30 }
 0x14b   :  { %932 = vmatprep.subr.bf16.mxu0 %v1146_v50 }
 0x14e   :  { %933 = vmatpush3.bf16.msra.mxu0 %v1016_v31 }
 0x14f   :  { %934 = vmatprep.subr.bf16.mxu0 %v1146_v50 }
 0x152   :  { %935 = vmatpush3.bf16.msra.mxu0 %v1017_v32 }
 0x153   :  { %936 = vmatprep.subr.bf16.mxu0 %v1146_v50 }
 0x156   :  { %937 = vmatpush3.bf16.msra.mxu0 %v1018_v33 }
 0x20c   :  { %v885_v34 = vpop.f32.mrb[0].mxu0 }
 0x20d   :  { %v886_v35 = vpop.f32.mrb[1].mxu0 }
 0x20e   :  { %v887_v36 = vadd.f32 %v886_v35, %v885_v34  ;;  %v888_v37 = vpop.f32.mrb[2].mxu0 }
 0x20f   :  { %v889_v38 = vpop.f32.mrb[3].mxu0 }
 0x210   :  { %v890_v39 = vadd.f32 %v889_v38, %v888_v37  ;;  %v608_v43 = vadd.f32 %v887_v36, %v818_v40 }
 0x212   :  { %v611_v47 = vadd.f32 %v890_v39, %v818_v40 }
 0x21c   :  { %v907_v41 = vpop.f32.mrb[8].mxu1 }
 0x21d   :  { %v908_v42 = vpop.f32.mrb[9].mxu1 }
 0x21e   :  { %v909_v44 = vadd.f32 %v908_v42, %v907_v41  ;;  %v910_v45 = vpop.f32.mrb[10].mxu1 }
 0x21f   :  { %v911_v46 = vpop.f32.mrb[11].mxu1 }
 0x220   :  { %v649_v48 = vadd.f32 %v909_v44, %v608_v43  ;;  %v912_v49 = vadd.f32 %v911_v46, %v910_v45 }
 0x222   :  { %v652_v50 = vadd.f32 %v912_v49, %v611_v47  ;;  %v655_v51 = vmax.f32 %v649_v48, 0.0 }
 0x224   :  { %v656_v52 = vmax.f32 %v652_v50, 0.0 }
 0x226   :  { %v657_v53 = vpack.c.bf16 %v656_v52, %v655_v51 }
 0x228   :  { %939 = vmatmul.mubr.bf16.vlgmr.msra.gmra.mrb[4].mxu0 %v657_v53 }
 0x2fb   :  { %v763_v55 = vpop.f32.mrb[4].mxu0 }
 0x2fc   :  { %v940_v56 = vpop.f32.mrb[5].mxu0  ;;  %v764_v58 = vadd.f32 %v851_v54, %v763_v55 }
 0x2fd   :  { %v766_v57 = vpop.f32.mrb[6].mxu0 }
 0x2fe   :  { %v767_v59 = vadd.f32 %v851_v54, %v766_v57  ;;  %v941_v60 = vpop.f32.mrb[7].mxu0 }
 0x300   :  { %v867_v61 = vpack.c.bf16 %v767_v59, %v764_v58 }
 0x302   :  { %868 = vst [vmem:[#allocation10] sm:$0xff] %v867_v61  }
 0x303   :  { %1118 = shalt.err (!%p1115_p8)
}
 0x304   :  { %s1119_s12 = scalar_lea.hbm %s1295_s7, 128 }
 0x305   :  { %p1120_p9 = scmp.ne.s32.totalorder %s1295_s7, %s1119_s12  ;;  %p1123_p10 = scmp.lt.u32.totalorder %s1119_s12, %s1295_s7 }
 0x307   :  { %p1125_p11 = pnand %p1123_p10, %p1120_p9 }
 0x309   :  { %1128 = shalt.err (!%p1125_p11)
}
 0x30a   :  { %791 = dma.vmem_to_hbm [thread:$0]  %s786_s9, 128, %s1295_s7, [#allocation4], %s1141_s1, %s1141_s1, %s1142_s25  }
 0x30b   :  { %1135 = dma.done.wait [#allocation4], 128  }
 0x30c   :  { %1136 = vsyncadd [#allocation4], 4294967168 }
 0x30d   :  { %795 = vsyncpa [#allocation3], 1 }
 0x30e   :  { %796 = vsyncpa [#allocation6], 1 }
 0x30f   :  { %797 = vsyncpa [#allocation9], 1 }
 0x310   :  { %798 = vsyncpa [#allocation4], 1 }

</bundles_post_ra>
